<compile_context>
chip_gen: v7x
topology: tpu7x:2x2x1
jax: 0.10.0
libtpu: 0.0.40
codegen_flags: <defaults>
</compile_context>

<pallas_src>
import jax
import jax.numpy as jnp
from jax.experimental import pallas as pl
from jax.experimental.pallas import tpu as pltpu


_LANES = 128
_BCAST_TILE_ROWS = 2048   # 2048 x 128 f32 = 1 MiB per buffer; ~4 MiB double-buffered
                          # in+out -> comfortably under scoped VMEM on v5e/v6e/v7x.


# ----------------------------------------------------------------------------
# Pallas kernel 1: coalesced "dist.broadcast" of a flat parameter bucket.
# ----------------------------------------------------------------------------
def _bcast_copy_kernel(src_ref, dst_ref):
    # broadcast-from-rank-0 on a single-device group == identity copy.
    dst_ref[...] = src_ref[...]


def _bucket_padded_elems(n):
    """Round a bucket length up so it reshapes to (rows, 128) with rows a
    multiple of the row tile (or of 8 for small buckets) -- no in-kernel
    masking and no scatter-into-zeros round trip needed."""
    rows = -(-n // _LANES)
    rows = -(-rows // 8) * 8
    if rows > _BCAST_TILE_ROWS:
        rows = -(-rows // _BCAST_TILE_ROWS) * _BCAST_TILE_ROWS
    return rows * _LANES


def _pallas_broadcast_bucket(flat):
    """Identity 'dist.broadcast' of a coalesced 1-D bucket via a tiled,
    input/output-aliased Pallas copy. `flat` length is pre-padded by the
    caller so it reshapes exactly into (rows, 128) with rows % tile == 0."""
    rows = flat.shape[0] // _LANES
    tile_rows = min(_BCAST_TILE_ROWS, rows)
    x2d = flat.reshape(rows, _LANES)
    out = pl.pallas_call(
        _bcast_copy_kernel,
        out_shape=jax.ShapeDtypeStruct((rows, _LANES), flat.dtype),
        grid=(rows // tile_rows,),
        in_specs=[pl.BlockSpec((tile_rows, _LANES), lambda i: (i, 0))],
        out_specs=pl.BlockSpec((tile_rows, _LANES), lambda i: (i, 0)),
        input_output_aliases={0: 0},   # P8: don't allocate a second HBM bucket
        compiler_params=pltpu.CompilerParams(
            dimension_semantics=("parallel",)),
    )(x2d)
    return out.reshape(-1)


# ----------------------------------------------------------------------------
# Pallas kernel 2: fused Conv2d (im2col-free), NCHW in -> NCHW out.
# ----------------------------------------------------------------------------
def _make_conv_kernel(wp, span, taps):
    """Kernel operating on one batch element.
    x_ref: (Cin, SP)  flattened, spatially padded image (lane dim = SP)
    w_ref: (T, Cout, Cin)  per-tap weight matrices
    b_ref: (Cout, 1)
    o_ref: (Cout, span)   span = H * Wp  (junk width-pad columns sliced off
                          outside; already in channel-major = NCHW order).
    """
    def kernel(x_ref, w_ref, b_ref, o_ref):
        acc = jnp.zeros(o_ref.shape, jnp.float32)
        for t, (kh, kw) in enumerate(taps):        # unrolled: 9 static taps
            start = kh * wp + kw                   # static lane offset
            chunk = x_ref[:, start:start + span]   # (Cin, span) shifted view
            acc = acc + jnp.dot(w_ref[t], chunk,
                                preferred_element_type=jnp.float32)
        # bias folded into the single output store (lane-dense, 288 lanes).
        o_ref[...] = (acc + b_ref[...]).astype(o_ref.dtype)
    return kernel


def _pallas_conv2d_nchw(x, weight, bias, pad=1):
    """Fused conv: stride 1, square kernel, 'same' padding.
    x: [N, C, H, W] (NCHW), weight: [Cout, Cin, KH, KW], bias: [Cout]."""
    N, C, H, W = x.shape
    Cout, Cin, KH, KW = weight.shape
    assert Cin == C
    Hp, Wp = H + 2 * pad, W + 2 * pad
    span = H * Wp                              # output columns per batch
    max_start = (KH - 1) * Wp + (KW - 1)
    sp = -(-(max_start + span) // _LANES) * _LANES   # lane-dense input width

    # One small pad + free reshapes; no 9x im2col copies, no transposes.
    xpad = jnp.pad(x, ((0, 0), (0, 0), (pad, pad), (pad, pad)))
    xf = xpad.reshape(N, C, Hp * Wp)
    xf = jnp.pad(xf, ((0, 0), (0, 0), (0, sp - Hp * Wp)))

    # Per-tap weight matrices and bias column (tiny, precomputed once).
    w_taps = jnp.transpose(weight, (2, 3, 0, 1)).reshape(KH * KW, Cout, Cin)
    b_col = bias.reshape(Cout, 1)

    taps = [(kh, kw) for kh in range(KH) for kw in range(KW)]
    kernel = _make_conv_kernel(Wp, span, taps)

    itemsize = jnp.dtype(x.dtype).itemsize
    cost = pl.CostEstimate(
        flops=2 * N * Cout * Cin * span * len(taps),
        transcendentals=0,
        bytes_accessed=itemsize * (N * C * sp + w_taps.size + b_col.size
                                   + N * Cout * span),
    )

    # Grid over batch; each block (a few KiB of VMEM) holds one full padded
    # image, so there is no per-tap HBM re-read. For large H*W this would be
    # additionally tiled over output rows; unnecessary at these shapes.
    out = pl.pallas_call(
        kernel,
        out_shape=jax.ShapeDtypeStruct((N, Cout, span), jnp.float32),
        grid=(N,),
        in_specs=[
            pl.BlockSpec((None, C, sp), lambda n: (n, 0, 0)),
            pl.BlockSpec((KH * KW, Cout, Cin), lambda n: (0, 0, 0)),
            pl.BlockSpec((Cout, 1), lambda n: (0, 0)),
        ],
        out_specs=pl.BlockSpec((None, Cout, span), lambda n: (n, 0, 0)),
        compiler_params=pltpu.CompilerParams(
            dimension_semantics=("parallel",)),   # v7x: shard batch over 2 TCs
        cost_estimate=cost,
    )(xf, w_taps, b_col)

    # Drop the Wp-padding columns: (N, Cout, H*Wp) -> (N, Cout, H, W). Output
    # is already channel-major, so no transpose back to NCHW is needed.
    return out.reshape(N, Cout, H, Wp)[:, :, :, :W]


# ----------------------------------------------------------------------------
# Wrapped module: small Conv2d (the "self.module" being data-paralleled)
# ----------------------------------------------------------------------------
class PallasConv2d:
    """Deterministically-initialized Conv2d(in_ch, out_ch, k, padding=pad)."""

    def __init__(self, key, in_ch, out_ch, ksize=3, pad=1):
        self.in_ch, self.out_ch, self.ksize, self.pad = in_ch, out_ch, ksize, pad
        kw_key, kb_key = jax.random.split(key)
        fan_in = in_ch * ksize * ksize
        bound = 1.0 / (fan_in ** 0.5)
        # PyTorch Conv2d weight layout: [C_out, C_in, kh, kw]
        self.weight = jax.random.uniform(
            kw_key, (out_ch, in_ch, ksize, ksize), jnp.float32, -bound, bound)
        self.bias = jax.random.uniform(kb_key, (out_ch,), jnp.float32, -bound, bound)

    # analogue of nn.Module.state_dict().values() / .buffers()
    def state_tensors(self):
        return [self.weight, self.bias]

    def load_state_tensors(self, tensors):
        self.weight, self.bias = tensors

    def buffers(self):
        return []  # no buffers (e.g. no BatchNorm running stats)

    def __call__(self, x):
        # NOTE: for v6e/v7x a bf16 fast path (cast x/weight, keep f32
        # accumulation) halves HBM/VMEM traffic; kept f32 here for exactness.
        return _pallas_conv2d_nchw(x, self.weight, self.bias, self.pad)


# ----------------------------------------------------------------------------
# CustomDistributedDataParallel (JAX / Pallas version)
# ----------------------------------------------------------------------------
class CustomDistributedDataParallel:
    def __init__(self, module, dim=0, broadcast_buffers=True, bucket_cap_mb=25):
        self.module = module
        self.dim = dim
        self.broadcast_buffers = broadcast_buffers
        self.broadcast_bucket_size = bucket_cap_mb * 1024 * 1024
        self._sync_params()

    def _dist_broadcast_coalesced(self, tensors, buffer_size):
        # _take_tensors: greedily bucket same-dtype tensors up to buffer_size.
        synced, bucket, bucket_bytes = [], [], 0
        for t in tensors:
            nbytes = t.size * t.dtype.itemsize
            if bucket and (bucket_bytes + nbytes > buffer_size
                           or t.dtype != bucket[0].dtype):
                synced.extend(self._broadcast_bucket(bucket))
                bucket, bucket_bytes = [], 0
            bucket.append(t)
            bucket_bytes += nbytes
        if bucket:
            synced.extend(self._broadcast_bucket(bucket))
        return synced

    def _broadcast_bucket(self, tensors):
        # _flatten_dense_tensors -> dist.broadcast (Pallas copy) -> _unflatten.
        # The bucket is built directly at the tile-aligned length (a single
        # concatenate) -- no extra scatter-into-zeros pass over the bucket.
        flats = [t.reshape(-1) for t in tensors]
        total = sum(t.size for t in tensors)
        padded = _bucket_padded_elems(total)
        if padded > total:
            flats.append(jnp.zeros((padded - total,), tensors[0].dtype))
        flat = jnp.concatenate(flats) if len(flats) > 1 else flats[0]
        flat = _pallas_broadcast_bucket(flat)
        out, off = [], 0
        for t in tensors:
            out.append(flat[off:off + t.size].reshape(t.shape))
            off += t.size
        return out

    def _sync_params(self):
        module_states = list(self.module.state_tensors())
        if len(module_states) > 0:
            synced = self._dist_broadcast_coalesced(module_states,
                                                    self.broadcast_bucket_size)
            self.module.load_state_tensors(synced)
        if self.broadcast_buffers:
            buffers = list(self.module.buffers())
            if len(buffers) > 0:
                self._dist_broadcast_coalesced(buffers, self.broadcast_bucket_size)

    def scatter(self, inputs, kwargs, device_ids):
        # TODO(synk): scatter_kwargs across multiple local devices; with a
        # single local device it degenerates to identity chunking.
        return [inputs], [kwargs]

    def forward(self, *inputs, **kwargs):
        inputs, kwargs = self.scatter(inputs, kwargs, [0])
        return self.module(*inputs[0], **kwargs[0])

    __call__ = forward


# ----------------------------------------------------------------------------
# Main
# ----------------------------------------------------------------------------
if __name__ == "__main__":
    key = jax.random.PRNGKey(0)
    k_x, k_mod = jax.random.split(key)

    # Input: NCHW, small shapes (PyTorch convention).
    x = jax.random.normal(k_x, (2, 4, 16, 16), jnp.float32)

    inner = PallasConv2d(k_mod, in_ch=4, out_ch=8, ksize=3, pad=1)
    ddp = CustomDistributedDataParallel(inner, dim=0)

    out = ddp(x)
    out = jax.block_until_ready(out)
    assert out.shape == (2, 8, 16, 16), out.shape

    # Correctness guard against XLA's conv.
    ref = jax.lax.conv_general_dilated(
        x, inner.weight, window_strides=(1, 1), padding=((1, 1), (1, 1)),
        dimension_numbers=("NCHW", "OIHW", "NCHW")) + inner.bias.reshape(1, -1, 1, 1)
    assert jnp.allclose(out, ref, atol=1e-4, rtol=1e-4)

    print("KERNEL_OK")
</pallas_src>

<mosaic_0001>
module attributes {stable_mosaic.version = 11 : i64} {
  func.func @_bcast_copy_kernel(%arg0: i32, %arg1: memref<8x128xf32, #tpu.memory_space<vmem>>, %arg2: memref<8x128xf32, #tpu.memory_space<vmem>>) attributes {dimension_semantics = [#tpu.dimension_semantics<parallel>], iteration_bounds = array<i64: 1>, scalar_prefetch = 0 : i64, scratch_operands = 0 : i64, tpu.core_type = #tpu.core_type<tc>, window_params = [{transform_indices = @transform_0, window_bounds = array<i64: 8, 128>}, {transform_indices = @transform_1, window_bounds = array<i64: 8, 128>}]} {
    %c0 = arith.constant 0 : index
    %c0_0 = arith.constant 0 : index
    %0 = vector.load %arg1[%c0, %c0_0] : memref<8x128xf32, #tpu.memory_space<vmem>>, vector<8x128xf32>
    %c0_1 = arith.constant 0 : index
    %c0_2 = arith.constant 0 : index
    %1 = vector.load %arg2[%c0_1, %c0_2] : memref<8x128xf32, #tpu.memory_space<vmem>>, vector<8x128xf32>
    tpu.vector_store %arg2[%c0_1, %c0_2], %0 {strides = array<i32>} : memref<8x128xf32, #tpu.memory_space<vmem>>, vector<8x128xf32>,
    return
  }
  func.func @transform_0(%arg0: i32) -> (i32, i32) {
    %c0_i32 = arith.constant 0 : i32
    %c0_i32_0 = arith.constant 0 : i32
    return %arg0, %c0_i32 : i32, i32
  }
  func.func @transform_1(%arg0: i32) -> (i32, i32) {
    %c0_i32 = arith.constant 0 : i32
    %c0_i32_0 = arith.constant 0 : i32
    return %arg0, %c0_i32 : i32, i32
  }
}

</mosaic_0001>

<bundles_post_ra>
// kernel: tpu_custom_call.1
= control target key start
LH: loop header
LB: loop body
LE: loop exit
PB: predicated region body
PF: predicated region fallthrough
CT: control target
= control target key end

     0   :  { %6 = vsyncpa [#allocation3], 0  ;;  %s124_s0 = inlined_call_operand.hbm [shape: f32[8,128], index: 0, kind: input, shape index: {}, may-alias: {0,1}]   ;;  %s125_s1 = inlined_call_operand.hbm [shape: f32[8,128], index: 1, kind: output, shape index: {}, may-alias: {0,1}]  }
   0x1   :  { %7 = vsyncpa [#allocation4], 0  ;;  %s88_s6 = smov [#allocation2]   ;;  %s40_s10 = scalar_lea.hbm %s124_s0, 128 }
   0x2   :  { %s14_s7 = sshll.u32 %s88_s6, 4  ;;  %p41_p0 = scmp.ne.s32.totalorder %s124_s0, %s40_s10  ;;  %s15_s7 = int_to_ptr.vmem [resolvable:$true] %s14_s7 }
   0x3   :  { %p44_p1 = scmp.lt.u32.totalorder %s40_s10, %s124_s0 }
   0x5   :  { %p46_p2 = pnand %p44_p1, %p41_p0 }
   0x7   :  { %49 = shalt.err (!%p46_p2)
}
   0x8   :  { %s50_s15 = scalar_lea.vmem %s15_s7, 128  ;;  %p55_p4 = scmp.lt.s32.totalorder %s15_s7, %s15_s7 }
   0x9   :  { %p51_p3 = scmp.ne.s32.totalorder %s15_s7, %s50_s15  ;;  %p56_p5 = scmp.lt.s32.totalorder %s50_s15, %s50_s15 }
   0xb   :  { %p57_p6 = por %p56_p5, %p55_p4 }
   0xd   :  { %p58_p7 = pnand %p57_p6, %p51_p3 }
   0xf   :  { %61 = shalt.err (!%p58_p7)
}
  0x10   :  { %17 = dma.hbm_to_vmem [thread:$0]  %s124_s0, 128, %s15_s7, [#allocation3]  }
  0x11   :  { %84 = dma.done.wait [#allocation3], 128  }
  0x12   :  { %85 = vsyncadd [#allocation3], 4294967168  ;;  %s89_s18 = smov [#allocation5]   ;;  %v21_v0 = vld [vmem:[#allocation2] sm:$0xff] }
  0x13   :  { %s29_s19 = sshll.u32 %s89_s18, 4  ;;  %22 = vst [vmem:[#allocation5] sm:$0xff] %v21_v0  ;;  %s30_s19 = int_to_ptr.vmem [resolvable:$true] %s29_s19 }
  0x14   :  { %s62_s20 = scalar_lea.vmem %s30_s19, 128  ;;  %p67_p9 = scmp.lt.s32.totalorder %s30_s19, %s30_s19 }
  0x15   :  { %p63_p8 = scmp.ne.s32.totalorder %s30_s19, %s62_s20  ;;  %p68_p10 = scmp.lt.s32.totalorder %s62_s20, %s62_s20 }
  0x17   :  { %p69_p11 = por %p68_p10, %p67_p9 }
  0x19   :  { %p70_p12 = pnand %p69_p11, %p63_p8 }
  0x1b   :  { %73 = shalt.err (!%p70_p12)
}
  0x1c   :  { %s74_s23 = scalar_lea.hbm %s125_s1, 128 }
  0x1d   :  { %p75_p13 = scmp.ne.s32.totalorder %s125_s1, %s74_s23  ;;  %p78_p0 = scmp.lt.u32.totalorder %s74_s23, %s125_s1 }
  0x1f   :  { %p80_p1 = pnand %p78_p0, %p75_p13 }
  0x21   :  { %83 = shalt.err (!%p80_p1)
}
  0x22   :  { %32 = dma.vmem_to_hbm [thread:$0]  %s30_s19, 128, %s125_s1, [#allocation4]  }
  0x23   :  { %86 = dma.done.wait [#allocation4], 128  }
  0x24   :  { %87 = vsyncadd [#allocation4], 4294967168 }
  0x25   :  { %36 = vsyncpa [#allocation3], 1 }
  0x26   :  { %37 = vsyncpa [#allocation4], 1 }

</bundles_post_ra>
